<compile_context>
chip_gen: v5e
topology: v5e:2x2
jax: 0.10.0
libtpu: 0.0.40
codegen_flags: <defaults>
</compile_context>

<pallas_src>
import numpy as np
import jax
import jax.numpy as jnp
from jax.experimental import pallas as pl
from jax.experimental.pallas import tpu as pltpu

# Small synthetic sizes: backbone feature map (B, C_feat, H, W) -> 1x1 conv -> embed_dim
B, C, H, W = 2, 4, 16, 16      # batch, backbone feature channels, spatial
E = 32                         # embed_dim
S = H * W                      # flattened spatial (lane axis, 256 = 2*128 -> lane-dense)


def hybrid_embed_kernel(x_ref, w_ref, b_ref, out_ref, glob_ref):
    """1x1-conv projection (VPU broadcast-FMA) + global spatial mean, single grid step.

    x_ref:    (B, C, S)  backbone features, spatial flattened onto the lane axis
    w_ref:    (E, C)     1x1 conv weight (used exactly as stored -> no transposes)
    b_ref:    (E, 1)     conv bias, broadcast over lanes
    out_ref:  (B, E, S)  projected features (lane-dense stores)
    glob_ref: (B, E, 1)  spatial mean of the projected features
    """
    x = x_ref[...]                                   # (B, C, S) f32
    w = w_ref[...]                                   # (E, C)
    bias = b_ref[...]                                # (E, 1)
    n_b, n_c, n_s = x_ref.shape
    inv_s = 1.0 / n_s

    # ---- 1x1 conv as unrolled VPU broadcast-FMA over the tiny contraction (C = 4) ----
    # (1, E, 1) * (B, 1, S) -> (B, E, S); batch folded into one vectorized pass.
    acc = w[None, :, 0:1] * x[:, 0:1, :]
    for c in range(1, n_c):
        acc = acc + w[None, :, c:c + 1] * x[:, c:c + 1, :]
    acc = acc + bias[None, :, :]
    out_ref[...] = acc.astype(out_ref.dtype)

    # ---- global spatial mean, computed algebraically pre-projection ----
    # mean_S(W x + b) == W (mean_S x) + b : reduce only (B, C=4, S) on the XLU.
    x_mean = jnp.sum(x, axis=-1, keepdims=True) * inv_s        # (B, C, 1)
    g = w[None, :, 0:1] * x_mean[:, 0:1, :]
    for c in range(1, n_c):
        g = g + w[None, :, c:c + 1] * x_mean[:, c:c + 1, :]
    g = g + bias[None, :, :]
    glob_ref[...] = g.astype(glob_ref.dtype)


def hybrid_embed(feat, proj_w, proj_b):
    """feat: (B, C, H, W) backbone output; proj_w: (E, C, 1, 1); proj_b: (E,).

    Returns (x, global_x) with x: (B, E, H, W) and global_x: (B, E, 1),
    matching the PyTorch module's forward.
    """
    b, c, h, w = feat.shape
    e = proj_w.shape[0]
    s = h * w

    x3 = feat.reshape(b, c, s)          # trailing-dim reshape only (no HBM transpose)
    w2 = proj_w.reshape(e, c)           # squeeze the 1x1 kernel dims
    b2 = proj_b.reshape(e, 1)

    y, g = pl.pallas_call(
        hybrid_embed_kernel,
        out_shape=(jax.ShapeDtypeStruct((b, e, s), jnp.float32),
                   jax.ShapeDtypeStruct((b, e, 1), jnp.float32)),
        grid=(1,),                      # single step: whole problem fits VMEM easily
        in_specs=[
            pl.BlockSpec((b, c, s), lambda i: (0, 0, 0)),
            pl.BlockSpec((e, c), lambda i: (0, 0)),
            pl.BlockSpec((e, 1), lambda i: (0, 0)),
        ],
        out_specs=(
            pl.BlockSpec((b, e, s), lambda i: (0, 0, 0)),
            pl.BlockSpec((b, e, 1), lambda i: (0, 0, 0)),
        ),
        compiler_params=pltpu.CompilerParams(dimension_semantics=("arbitrary",)),
    )(x3, w2, b2)

    return y.reshape(b, e, h, w), g


def _reference(feat, proj_w, proj_b):
    """Pure-JAX reference replicating HybridEmbed.forward (after the backbone)."""
    e, c = proj_w.shape[0], proj_w.shape[1]
    w2 = proj_w.reshape(e, c)
    y = jnp.einsum("bchw,ec->behw", feat, w2) + proj_b[None, :, None, None]
    g = jnp.mean(y, axis=(2, 3))[:, :, None]
    return y, g


if __name__ == "__main__":
    key = jax.random.PRNGKey(0)
    k_x, k_w, k_b = jax.random.split(key, 3)

    # TODO(synk): `backbone` is an arbitrary external nn.Module; it has no generic Pallas
    # equivalent, so the kernel consumes the backbone's output feature map directly.
    feat = jax.random.normal(k_x, (B, C, H, W), jnp.float32)
    proj_w = 0.1 * jax.random.normal(k_w, (E, C, 1, 1), jnp.float32)
    proj_b = 0.1 * jax.random.normal(k_b, (E,), jnp.float32)

    x_out, global_x = hybrid_embed(feat, proj_w, proj_b)
    x_out = jax.block_until_ready(x_out)
    global_x = jax.block_until_ready(global_x)

    y_ref, g_ref = _reference(feat, proj_w, proj_b)
    np.testing.assert_allclose(np.asarray(x_out), np.asarray(y_ref), rtol=1e-5, atol=1e-5)
    np.testing.assert_allclose(np.asarray(global_x), np.asarray(g_ref), rtol=1e-5, atol=1e-5)

    print("KERNEL_OK")
</pallas_src>

<mosaic_0001>
module attributes {stable_mosaic.version = 11 : i64} {
  func.func @hybrid_embed_kernel(%arg0: i32, %arg1: memref<2x4x256xf32, #tpu.memory_space<vmem>>, %arg2: memref<32x4xf32, #tpu.memory_space<vmem>>, %arg3: memref<32x1xf32, #tpu.memory_space<vmem>>, %arg4: memref<2x32x256xf32, #tpu.memory_space<vmem>>, %arg5: memref<2x32x1xf32, #tpu.memory_space<vmem>>) attributes {dimension_semantics = [#tpu.dimension_semantics<arbitrary>], iteration_bounds = array<i64: 1>, scalar_prefetch = 0 : i64, scratch_operands = 0 : i64, tpu.core_type = #tpu.core_type<tc>, window_params = [{pipeline_mode = #tpu.pipeline_mode<synchronous>, transform_indices = @transform_0, window_bounds = array<i64: 2, 4, 256>}, {pipeline_mode = #tpu.pipeline_mode<synchronous>, transform_indices = @transform_1, window_bounds = array<i64: 32, 4>}, {pipeline_mode = #tpu.pipeline_mode<synchronous>, transform_indices = @transform_2, window_bounds = array<i64: 32, 1>}, {pipeline_mode = #tpu.pipeline_mode<synchronous>, transform_indices = @transform_3, window_bounds = array<i64: 2, 32, 256>}, {pipeline_mode = #tpu.pipeline_mode<synchronous>, transform_indices = @transform_4, window_bounds = array<i64: 2, 32, 1>}]} {
    %c0 = arith.constant 0 : index
    %c0_0 = arith.constant 0 : index
    %c0_1 = arith.constant 0 : index
    %0 = vector.load %arg1[%c0, %c0_0, %c0_1] : memref<2x4x256xf32, #tpu.memory_space<vmem>>, vector<2x4x256xf32>
    %c0_2 = arith.constant 0 : index
    %c0_3 = arith.constant 0 : index
    %1 = vector.load %arg2[%c0_2, %c0_3] : memref<32x4xf32, #tpu.memory_space<vmem>>, vector<32x4xf32>
    %c0_4 = arith.constant 0 : index
    %c0_5 = arith.constant 0 : index
    %2 = vector.load %arg3[%c0_4, %c0_5] : memref<32x1xf32, #tpu.memory_space<vmem>>, vector<32x1xf32>
    %3 = vector.extract_strided_slice %1 {offsets = [0, 0], sizes = [32, 1], strides = [1, 1]} : vector<32x4xf32> to vector<32x1xf32>
    %4 = vector.shape_cast %3 : vector<32x1xf32> to vector<1x32x1xf32>
    %5 = vector.extract_strided_slice %0 {offsets = [0, 0, 0], sizes = [2, 1, 256], strides = [1, 1, 1]} : vector<2x4x256xf32> to vector<2x1x256xf32>
    %6 = vector.broadcast %4 : vector<1x32x1xf32> to vector<2x32x256xf32>
    %7 = vector.broadcast %5 : vector<2x1x256xf32> to vector<2x32x256xf32>
    %8 = arith.mulf %6, %7 : vector<2x32x256xf32>
    %9 = vector.extract_strided_slice %1 {offsets = [0, 1], sizes = [32, 1], strides = [1, 1]} : vector<32x4xf32> to vector<32x1xf32>
    %10 = vector.shape_cast %9 : vector<32x1xf32> to vector<1x32x1xf32>
    %11 = vector.extract_strided_slice %0 {offsets = [0, 1, 0], sizes = [2, 1, 256], strides = [1, 1, 1]} : vector<2x4x256xf32> to vector<2x1x256xf32>
    %12 = vector.broadcast %10 : vector<1x32x1xf32> to vector<2x32x256xf32>
    %13 = vector.broadcast %11 : vector<2x1x256xf32> to vector<2x32x256xf32>
    %14 = arith.mulf %12, %13 : vector<2x32x256xf32>
    %15 = arith.addf %8, %14 : vector<2x32x256xf32>
    %16 = vector.extract_strided_slice %1 {offsets = [0, 2], sizes = [32, 1], strides = [1, 1]} : vector<32x4xf32> to vector<32x1xf32>
    %17 = vector.shape_cast %16 : vector<32x1xf32> to vector<1x32x1xf32>
    %18 = vector.extract_strided_slice %0 {offsets = [0, 2, 0], sizes = [2, 1, 256], strides = [1, 1, 1]} : vector<2x4x256xf32> to vector<2x1x256xf32>
    %19 = vector.broadcast %17 : vector<1x32x1xf32> to vector<2x32x256xf32>
    %20 = vector.broadcast %18 : vector<2x1x256xf32> to vector<2x32x256xf32>
    %21 = arith.mulf %19, %20 : vector<2x32x256xf32>
    %22 = arith.addf %15, %21 : vector<2x32x256xf32>
    %23 = vector.extract_strided_slice %1 {offsets = [0, 3], sizes = [32, 1], strides = [1, 1]} : vector<32x4xf32> to vector<32x1xf32>
    %24 = vector.shape_cast %23 : vector<32x1xf32> to vector<1x32x1xf32>
    %25 = vector.extract_strided_slice %0 {offsets = [0, 3, 0], sizes = [2, 1, 256], strides = [1, 1, 1]} : vector<2x4x256xf32> to vector<2x1x256xf32>
    %26 = vector.broadcast %24 : vector<1x32x1xf32> to vector<2x32x256xf32>
    %27 = vector.broadcast %25 : vector<2x1x256xf32> to vector<2x32x256xf32>
    %28 = arith.mulf %26, %27 : vector<2x32x256xf32>
    %29 = arith.addf %22, %28 : vector<2x32x256xf32>
    %30 = vector.shape_cast %2 : vector<32x1xf32> to vector<1x32x1xf32>
    %31 = vector.broadcast %30 : vector<1x32x1xf32> to vector<2x32x256xf32>
    %32 = arith.addf %29, %31 : vector<2x32x256xf32>
    %c0_6 = arith.constant 0 : index
    %c0_7 = arith.constant 0 : index
    %c0_8 = arith.constant 0 : index
    %33 = vector.load %arg4[%c0_6, %c0_7, %c0_8] : memref<2x32x256xf32, #tpu.memory_space<vmem>>, vector<2x32x256xf32>
    tpu.vector_store %arg4[%c0_6, %c0_7, %c0_8], %32 {strides = array<i32>} : memref<2x32x256xf32, #tpu.memory_space<vmem>>, vector<2x32x256xf32>,
    %cst = arith.constant dense<0.000000e+00> : vector<2x4xf32>
    %34 = vector.multi_reduction <add>, %0, %cst [2] : vector<2x4x256xf32> to vector<2x4xf32>
    %35 = vector.shape_cast %34 : vector<2x4xf32> to vector<2x4x1xf32>
    %cst_9 = arith.constant 3.906250e-03 : f32
    %36 = vector.broadcast %cst_9 : f32 to vector<2x4x1xf32>
    %37 = arith.mulf %35, %36 : vector<2x4x1xf32>
    %38 = vector.extract_strided_slice %1 {offsets = [0, 0], sizes = [32, 1], strides = [1, 1]} : vector<32x4xf32> to vector<32x1xf32>
    %39 = vector.shape_cast %38 : vector<32x1xf32> to vector<1x32x1xf32>
    %40 = vector.extract_strided_slice %37 {offsets = [0, 0, 0], sizes = [2, 1, 1], strides = [1, 1, 1]} : vector<2x4x1xf32> to vector<2x1x1xf32>
    %41 = vector.broadcast %39 : vector<1x32x1xf32> to vector<2x32x1xf32>
    %42 = vector.broadcast %40 : vector<2x1x1xf32> to vector<2x32x1xf32>
    %43 = arith.mulf %41, %42 : vector<2x32x1xf32>
    %44 = vector.extract_strided_slice %1 {offsets = [0, 1], sizes = [32, 1], strides = [1, 1]} : vector<32x4xf32> to vector<32x1xf32>
    %45 = vector.shape_cast %44 : vector<32x1xf32> to vector<1x32x1xf32>
    %46 = vector.extract_strided_slice %37 {offsets = [0, 1, 0], sizes = [2, 1, 1], strides = [1, 1, 1]} : vector<2x4x1xf32> to vector<2x1x1xf32>
    %47 = vector.broadcast %45 : vector<1x32x1xf32> to vector<2x32x1xf32>
    %48 = vector.broadcast %46 : vector<2x1x1xf32> to vector<2x32x1xf32>
    %49 = arith.mulf %47, %48 : vector<2x32x1xf32>
    %50 = arith.addf %43, %49 : vector<2x32x1xf32>
    %51 = vector.extract_strided_slice %1 {offsets = [0, 2], sizes = [32, 1], strides = [1, 1]} : vector<32x4xf32> to vector<32x1xf32>
    %52 = vector.shape_cast %51 : vector<32x1xf32> to vector<1x32x1xf32>
    %53 = vector.extract_strided_slice %37 {offsets = [0, 2, 0], sizes = [2, 1, 1], strides = [1, 1, 1]} : vector<2x4x1xf32> to vector<2x1x1xf32>
    %54 = vector.broadcast %52 : vector<1x32x1xf32> to vector<2x32x1xf32>
    %55 = vector.broadcast %53 : vector<2x1x1xf32> to vector<2x32x1xf32>
    %56 = arith.mulf %54, %55 : vector<2x32x1xf32>
    %57 = arith.addf %50, %56 : vector<2x32x1xf32>
    %58 = vector.extract_strided_slice %1 {offsets = [0, 3], sizes = [32, 1], strides = [1, 1]} : vector<32x4xf32> to vector<32x1xf32>
    %59 = vector.shape_cast %58 : vector<32x1xf32> to vector<1x32x1xf32>
    %60 = vector.extract_strided_slice %37 {offsets = [0, 3, 0], sizes = [2, 1, 1], strides = [1, 1, 1]} : vector<2x4x1xf32> to vector<2x1x1xf32>
    %61 = vector.broadcast %59 : vector<1x32x1xf32> to vector<2x32x1xf32>
    %62 = vector.broadcast %60 : vector<2x1x1xf32> to vector<2x32x1xf32>
    %63 = arith.mulf %61, %62 : vector<2x32x1xf32>
    %64 = arith.addf %57, %63 : vector<2x32x1xf32>
    %65 = vector.shape_cast %2 : vector<32x1xf32> to vector<1x32x1xf32>
    %66 = vector.broadcast %65 : vector<1x32x1xf32> to vector<2x32x1xf32>
    %67 = arith.addf %64, %66 : vector<2x32x1xf32>
    %c0_10 = arith.constant 0 : index
    %c0_11 = arith.constant 0 : index
    %c0_12 = arith.constant 0 : index
    %68 = vector.load %arg5[%c0_10, %c0_11, %c0_12] : memref<2x32x1xf32, #tpu.memory_space<vmem>>, vector<2x32x1xf32>
    tpu.vector_store %arg5[%c0_10, %c0_11, %c0_12], %67 {strides = array<i32>} : memref<2x32x1xf32, #tpu.memory_space<vmem>>, vector<2x32x1xf32>,
    return
  }
  func.func @transform_0(%arg0: i32) -> (i32, i32, i32) {
    %c0_i32 = arith.constant 0 : i32
    %c0_i32_0 = arith.constant 0 : i32
    %c0_i32_1 = arith.constant 0 : i32
    %c0_i32_2 = arith.constant 0 : i32
    return %c0_i32, %c0_i32_0, %c0_i32_1 : i32, i32, i32
  }
  func.func @transform_1(%arg0: i32) -> (i32, i32) {
    %c0_i32 = arith.constant 0 : i32
    %c0_i32_0 = arith.constant 0 : i32
    %c0_i32_1 = arith.constant 0 : i32
    return %c0_i32, %c0_i32_0 : i32, i32
  }
  func.func @transform_2(%arg0: i32) -> (i32, i32) {
    %c0_i32 = arith.constant 0 : i32
    %c0_i32_0 = arith.constant 0 : i32
    %c0_i32_1 = arith.constant 0 : i32
    return %c0_i32, %c0_i32_0 : i32, i32
  }
  func.func @transform_3(%arg0: i32) -> (i32, i32, i32) {
    %c0_i32 = arith.constant 0 : i32
    %c0_i32_0 = arith.constant 0 : i32
    %c0_i32_1 = arith.constant 0 : i32
    %c0_i32_2 = arith.constant 0 : i32
    return %c0_i32, %c0_i32_0, %c0_i32_1 : i32, i32, i32
  }
  func.func @transform_4(%arg0: i32) -> (i32, i32, i32) {
    %c0_i32 = arith.constant 0 : i32
    %c0_i32_0 = arith.constant 0 : i32
    %c0_i32_1 = arith.constant 0 : i32
    %c0_i32_2 = arith.constant 0 : i32
    return %c0_i32, %c0_i32_0, %c0_i32_1 : i32, i32, i32
  }
}

</mosaic_0001>

<bundles_post_ra>
// kernel: tpu_custom_call.1
= control target key start
LH: loop header
LB: loop body
LE: loop exit
PB: predicated region body
PF: predicated region fallthrough
CT: control target
= control target key end

     0   :  { %v580_v2 = vmov 1   ;;  %s967_s0 = inlined_call_operand.vmem [shape: f32[2,4,256], index: 0, kind: input, shape index: {}]   ;;  %s968_s1 = inlined_call_operand.vmem [shape: f32[32,4], index: 1, kind: input, shape index: {}]   ;;  %s969_s2 = inlined_call_operand.vmem [shape: f32[32,1], index: 2, kind: input, shape index: {}]   ;;  %s970_s3 = inlined_call_operand.hbm [shape: f32[2,32,256], index: 3, kind: output, shape index: {0}]   ;;  %s971_s4 = inlined_call_operand.vmem [shape: f32[2,32,1], index: 4, kind: output, shape index: {1}]  }
   0x1   :  { %v618_v0 = vld [vmem:[%s968_s1 + $0x10] sm:$0xff]  ;;  %v623_v1 = vld [vmem:[%s968_s1] sm:$0xff]  ;;  %544 = vset.pattern.permute.xlu0 %v580_v2  ;;  %543 = vset.pattern.permute.xlu2 %v580_v2 }
   0x2   :  { %10 = vsyncpa [#allocation3], 0  ;;  %v581_v3 = vmov 0   ;;  %86 = vperm.xlu0 %544, %v618_v0   ;;  %78 = vperm.xlu2 %543, %v623_v1   ;;  %v631_v4 = vld [vmem:[%s968_s1 + $0x18] sm:$0xff]  ;;  %v636_v5 = vld [vmem:[%s968_s1 + $0x8] sm:$0xff]  ;;  %v582_v6 = vmov 2  }
   0x3   :  { %542 = vset.pattern.permute.xlu1 %v581_v3  ;;  %v650_v7 = vld [vmem:[%s967_s0 + $0x8] sm:$0xff]  ;;  %v656_v8 = vld [vmem:[%s969_s2] sm:$0xff]  ;;  %v583_v9 = vmov 3   ;;  %v666_v10 = vld [vmem:[%s969_s2 + $0x10] sm:$0xff]  ;;  %vm320_vm0 = vcmask 1043456   ;;  %s586_s8 = smov 125  }
   0x4   :  { %39 = vperm.xlu1 %542, %v618_v0   ;;  %313 = vst [vmem:[#allocation1 + $0x10] ss:$2 sm:$0xff] %v650_v7  ;;  %v671_v11 = vld [vmem:[%s967_s0] sm:$0xff]  ;;  %v676_v12 = vld [vmem:[%s969_s2 + $0x8] sm:$0xff]  ;;  %v684_v13 = vld [vmem:[%s969_s2 + $0x18] sm:$0xff]  ;;  %v95_v33 = vperm.slane %v650_v7, 1 }
   0x5   :  { %309 = vst [vmem:[#allocation1] ss:$2 sm:$0xff] %v671_v11  ;;  %v93_v31 = vperm.slane %v671_v11, 1  ;;  %v94_v32 = vperm.slane %v671_v11, 5  ;;  %v96_v34 = vperm.slane %v650_v7, 5  ;;  %v153_v37 = vperm.slane %v671_v11, 2 }
   0x6   :  { %v49_v38 = vperm.slane %v671_v11, 0  ;;  %v154_v39 = vperm.slane %v671_v11, 6  ;;  %v155_v40 = vperm.slane %v650_v7, 2  ;;  %v156_v41 = vperm.slane %v650_v7, 6  ;;  %s584_s0 = smov 127   ;;  %s585_s2 = smov 126  }
   0x7   :  { %v50_v42 = vperm.slane %v671_v11, 4  ;;  %v709_v44 = vperm.slane %v93_v31, 1  ;;  %v711_v45 = vperm.slane %v94_v32, 1  ;;  %v51_v46 = vperm.slane %v650_v7, 0  ;;  %s516_s11 = sshll.u32 %s970_s3, 4  ;;  %s587_s12 = smov [#allocation2]   ;;  %s517_s11 = int_to_ptr.hbm [resolvable:$true] %s516_s11 }
   0x8   :  { %v52_v47 = vperm.slane %v650_v7, 4  ;;  %v715_v48 = vperm.slane %v95_v33, 1  ;;  %v717_v49 = vperm.slane %v96_v34, 1  ;;  %v213_v50 = vperm.slane %v671_v11, 3  ;;  %s514_s13 = sshll.u32 %s587_s12, 4  ;;  %s588_s14 = smov 256   ;;  %s515_s13 = int_to_ptr.vmem [resolvable:$true] %s514_s13 }
   0x9   :  { %v720_v51 = vperm.slane %v153_v37, 2  ;;  %v722_v52 = vperm.slane %v49_v38, 0  ;;  %v214_v53 = vperm.slane %v671_v11, 7  ;;  %v215_v54 = vperm.slane %v650_v7, 3  ;;  %s589_s15 = smov 16  }
   0xa   :  { %548 = vset.pattern.permute.xlu0 %v582_v6  ;;  %82 = vperm.xlu2 %543, %v636_v5   ;;  %v726_v55 = vperm.slane %v154_v39, 2  ;;  %v728_v56 = vperm.slane %v155_v40, 2  ;;  %v730_v57 = vperm.slane %v156_v41, 2  ;;  %v732_v58 = vperm.slane %v50_v42, 0 }
   0xb   :  { %150 = vperm.xlu0 %548, %v631_v4   ;;  %v314_v14 = vld.sshfl [vmem:[#allocation1 + $0x10] sm:$0xff pattern:$0x75316420]  ;;  %v315_v15 = vld.sshfl [vmem:[#allocation1 + $0x18] sm:$0xff pattern:$0x75316420] }
   0xc   :  { %44 = vperm.xlu1 %542, %v631_v4   ;;  %v326_v16 = vsel %vm320_vm0, %v314_v14, 0.0  ;;  %v327_v17 = vsel %vm320_vm0, %v315_v15, 0.0  ;;  %v310_v19 = vld.sshfl [vmem:[#allocation1] sm:$0xff pattern:$0x75316420]  ;;  %v736_v61 = vperm.slane %v51_v46, 0 }
   0xd   :  { %v328_v18 = vadd.f32 %v327_v17, %v326_v16  ;;  %v311_v20 = vld.sshfl [vmem:[#allocation1 + $0x8] sm:$0xff pattern:$0x75316420]  ;;  %v321_v21 = vsel %vm320_vm0, %v310_v19, 0.0  ;;  %v738_v62 = vperm.slane %v52_v47, 0  ;;  %v749_v15 = vperm.slane %v214_v53, 3 }
   0xe   :  { %v322_v22 = vsel %vm320_vm0, %v311_v20, 0.0  ;;  %v751_v16 = vperm.slane %v215_v54, 3  ;;  %vm501_vm1 = vcmask 7168  }
   0xf   :  { %v323_v23 = vadd.f32 %v322_v22, %v321_v21 }
  0x12   :  { %546 = vset.pattern.permute.xlu2 %v582_v6 }
  0x13   :  { %549 = vset.pattern.permute.xlu0 %v581_v3  ;;  %138 = vperm.xlu2 %546, %v623_v1  }
  0x14   :  { %545 = vset.pattern.permute.xlu1 %v580_v2  ;;  %29 = vperm.xlu0 %549, %v623_v1  }
  0x15   :  { %90 = vperm.xlu1 %545, %v631_v4  }
  0x1b   :  { %146 = vperm.xlu2 %546, %v618_v0  }
  0x1c   :  { %34 = vperm.xlu0 %549, %v636_v5  }
  0x1d   :  { %547 = vset.pattern.permute.xlu1 %v582_v6  ;;  %v743_v6 = vperm.slane %v213_v50, 3 }
  0x1e   :  { %142 = vperm.xlu1 %547, %v636_v5  }
  0x23   :  { %551 = vset.pattern.permute.xlu2 %v583_v9 }
  0x24   :  { %259 = vperm.xlu0 %549, %v656_v8   ;;  %202 = vperm.xlu2 %551, %v636_v5  }
  0x26   :  { %550 = vset.pattern.permute.xlu1 %v583_v9 }
  0x27   :  { %198 = vperm.xlu1 %550, %v623_v1  }
  0x2c   :  { %210 = vperm.xlu2 %551, %v631_v4  }
  0x2f   :  { %206 = vperm.xlu1 %550, %v618_v0  }
  0x34   :  { %553 = vset.pattern.permute.xlu2 %v581_v3 }
  0x35   :  { %269 = vperm.xlu2 %553, %v666_v10  }
  0x37   :  { %552 = vset.pattern.permute.xlu1 %v581_v3  ;;  %v216_v3 = vperm.slane %v650_v7, 7 }
  0x38   :  { %264 = vperm.xlu1 %552, %v676_v12  }
  0x39   :  { %v767_v34 = vperm.slane %v216_v3, 3 }
  0x40   :  { %274 = vperm.xlu1 %552, %v684_v13  }
  0x4e   :  { %329 = vadd.xlane.f32.xlu0 %v328_v18 }
  0x5c   :  { %v79_v24 = vpop.permute.xlu2 %78 }
  0x5d   :  { %v105_v59 = vmul.f32 %v709_v44, %v79_v24  ;;  %v106_v60 = vmul.f32 %v711_v45, %v79_v24  ;;  %v113_v63 = vmul.f32 %v715_v48, %v79_v24  ;;  %v114_v2 = vmul.f32 %v717_v49, %v79_v24 }
  0x5e   :  { %324 = vadd.xlane.f32.xlu2 %v323_v23 }
  0x64   :  { %v687_v25 = vpop.permute.xlu2 %82 }
  0x65   :  { %v107_v31 = vmul.f32 %v709_v44, %v687_v25 }
  0x6d   :  { %v689_v28 = vpop.permute.xlu2 %138 }
  0x6e   :  { %v165_v38 = vmul.f32 %v720_v51, %v689_v28  ;;  %v166_v39 = vmul.f32 %v726_v55, %v689_v28 }
  0x74   :  { %v87_v27 = vpop.permute.xlu0 %86 }
  0x75   :  { %v699_v35 = vpop.permute.xlu2 %146  ;;  %v109_v11 = vmul.f32 %v709_v44, %v87_v27  ;;  %v110_v21 = vmul.f32 %v711_v45, %v87_v27  ;;  %v117_v22 = vmul.f32 %v715_v48, %v87_v27  ;;  %v118_v32 = vmul.f32 %v717_v49, %v87_v27 }
  0x76   :  { %v40_v26 = vpop.permute.xlu1 %39  ;;  %v169_v41 = vmul.f32 %v720_v51, %v699_v35  ;;  %v174_v27 = vmul.f32 %v730_v57, %v689_v28  ;;  %v170_v3 = vmul.f32 %v726_v55, %v699_v35 }
  0x77   :  { %v65_v14 = vmul.f32 %v722_v52, %v40_v26  ;;  %v66_v23 = vmul.f32 %v732_v58, %v40_v26  ;;  %v73_v24 = vmul.f32 %v736_v61, %v40_v26  ;;  %v74_v33 = vmul.f32 %v738_v62, %v40_v26 }
  0x78   :  { %v173_v26 = vmul.f32 %v728_v56, %v689_v28  ;;  %v116_v28 = vmul.f32 %v717_v49, %v687_v25 }
  0x79   :  { %v125_v40 = vadd.f32 %v109_v11, %v65_v14  ;;  %v126_v50 = vadd.f32 %v110_v21, %v66_v23  ;;  %v133_v53 = vadd.f32 %v117_v22, %v73_v24  ;;  %v134_v54 = vadd.f32 %v118_v32, %v74_v33 }
  0x7a   :  { %v177_v11 = vmul.f32 %v728_v56, %v699_v35 }
  0x7b   :  { %v186_v24 = vadd.f32 %v170_v3, %v126_v50 }
  0x7c   :  { %v193_v32 = vadd.f32 %v177_v11, %v133_v53 }
  0x7d   :  { %v693_v30 = vpop.permute.xlu0 %150 }
  0x7e   :  { %v691_v29 = vpop.permute.xlu1 %44  ;;  %v753_v17 = vpop.permute.xlu2 %202 }
  0x7f   :  { %v68_v50 = vmul.f32 %v732_v58, %v691_v29  ;;  %v75_v11 = vmul.f32 %v736_v61, %v691_v29 }
  0x86   :  { %v30_v43 = vpop.permute.xlu0 %29 }
  0x87   :  { %v701_v36 = vpop.permute.xlu1 %90  ;;  %v61_v18 = vmul.f32 %v722_v52, %v30_v43  ;;  %v62_v19 = vmul.f32 %v732_v58, %v30_v43  ;;  %v69_v7 = vmul.f32 %v736_v61, %v30_v43  ;;  %v70_v20 = vmul.f32 %v738_v62, %v30_v43 }
  0x89   :  { %v121_v42 = vadd.f32 %v105_v59, %v61_v18  ;;  %v122_v43 = vadd.f32 %v106_v60, %v62_v19  ;;  %v129_v46 = vadd.f32 %v113_v63, %v69_v7  ;;  %v130_v47 = vadd.f32 %v114_v2, %v70_v20 }
  0x8a   :  { %v178_v59 = vmul.f32 %v730_v57, %v699_v35  ;;  %v108_v60 = vmul.f32 %v711_v45, %v687_v25  ;;  %v115_v63 = vmul.f32 %v715_v48, %v687_v25  ;;  %v185_v2 = vadd.f32 %v169_v41, %v125_v40  ;;  %v797_v40 = vpop.permute.xlu2 %210 }
  0x8b   :  { %v181_v18 = vadd.f32 %v165_v38, %v121_v42  ;;  %v182_v19 = vadd.f32 %v166_v39, %v122_v43  ;;  %v189_v7 = vadd.f32 %v173_v26, %v129_v46  ;;  %v190_v20 = vadd.f32 %v174_v27, %v130_v47 }
  0x8c   :  { %v194_v33 = vadd.f32 %v178_v59, %v134_v54  ;;  %v67_v25 = vmul.f32 %v722_v52, %v691_v29  ;;  %v76_v59 = vmul.f32 %v738_v62, %v691_v29 }
  0x8e   :  { %v35_v37 = vpop.permute.xlu0 %34 }
  0x8f   :  { %v63_v46 = vmul.f32 %v722_v52, %v35_v37  ;;  %v64_v47 = vmul.f32 %v732_v58, %v35_v37  ;;  %v71_v26 = vmul.f32 %v736_v61, %v35_v37  ;;  %v72_v27 = vmul.f32 %v738_v62, %v35_v37 }
  0x90   :  { %v745_v9 = vpop.permute.xlu1 %142  ;;  %v171_v52 = vmul.f32 %v720_v51, %v693_v30 }
  0x91   :  { %v168_v37 = vmul.f32 %v726_v55, %v745_v9  ;;  %v175_v58 = vmul.f32 %v728_v56, %v745_v9  ;;  %v123_v61 = vadd.f32 %v107_v31, %v63_v46  ;;  %v131_v29 = vadd.f32 %v115_v63, %v71_v26 }
  0x92   :  { %v132_v62 = vadd.f32 %v116_v28, %v72_v27  ;;  %v112_v31 = vmul.f32 %v711_v45, %v701_v36  ;;  %v270_v46 = vpop.permute.xlu2 %269  ;;  %v227_v45 = vmul.f32 %v743_v6, %v753_v17 }
  0x96   :  { %v260_v38 = vpop.permute.xlu0 %259 }
  0x99   :  { %v199_v14 = vpop.permute.xlu1 %198 }
  0x9a   :  { %v225_v21 = vmul.f32 %v743_v6, %v199_v14  ;;  %v226_v22 = vmul.f32 %v749_v15, %v199_v14  ;;  %v233_v35 = vmul.f32 %v751_v16, %v199_v14  ;;  %v234_v23 = vmul.f32 %v767_v34, %v199_v14 }
  0x9c   :  { %v241_v39 = vadd.f32 %v225_v21, %v181_v18  ;;  %v242_v41 = vadd.f32 %v226_v22, %v182_v19  ;;  %v249_v42 = vadd.f32 %v233_v35, %v189_v7  ;;  %v250_v43 = vadd.f32 %v234_v23, %v190_v20 }
  0x9d   :  { %v167_v18 = vmul.f32 %v720_v51, %v745_v9  ;;  %v176_v19 = vmul.f32 %v730_v57, %v745_v9  ;;  %v124_v7 = vadd.f32 %v108_v60, %v64_v47  ;;  %v172_v23 = vmul.f32 %v726_v55, %v693_v30 }
  0x9e   :  { %v277_v53 = vadd.f32 %v260_v38, %v241_v39  ;;  %v278_v54 = vadd.f32 %v260_v38, %v242_v41  ;;  %v285_v3 = vadd.f32 %v260_v38, %v249_v42  ;;  %v286_v14 = vadd.f32 %v260_v38, %v250_v43 }
  0x9f   :  { %v111_v9 = vmul.f32 %v709_v44, %v701_v36  ;;  %v119_v60 = vmul.f32 %v715_v48, %v701_v36  ;;  %v120_v41 = vmul.f32 %v717_v49, %v701_v36  ;;  %v183_v42 = vadd.f32 %v167_v18, %v123_v61 }
  0xa0   :  { %293 = vst [vmem:[#allocation2] sm:$0xff] %v277_v53  ;;  %v184_v43 = vadd.f32 %v168_v37, %v124_v7  ;;  %v191_v55 = vadd.f32 %v175_v58, %v131_v29  ;;  %v192_v47 = vadd.f32 %v176_v19, %v132_v62  ;;  %v228_v48 = vmul.f32 %v749_v15, %v753_v17 }
  0xa1   :  { %294 = vst [vmem:[#allocation2 + $0x8] sm:$0xff] %v278_v54  ;;  %v207_v20 = vpop.permute.xlu1 %206  ;;  %v179_v36 = vmul.f32 %v728_v56, %v693_v30  ;;  %v236_v49 = vmul.f32 %v767_v34, %v753_v17  ;;  %v135_v53 = vadd.f32 %v119_v60, %v75_v11  ;;  %v243_v54 = vadd.f32 %v227_v45, %v183_v42 }
  0xa2   :  { %301 = vst [vmem:[#allocation2 + $0x40] sm:$0xff] %v285_v3  ;;  %v229_v21 = vmul.f32 %v743_v6, %v207_v20  ;;  %v230_v51 = vmul.f32 %v749_v15, %v207_v20  ;;  %v237_v22 = vmul.f32 %v751_v16, %v207_v20  ;;  %v238_v35 = vmul.f32 %v767_v34, %v207_v20 }
  0xa3   :  { %302 = vst [vmem:[#allocation2 + $0x48] sm:$0xff] %v286_v14  ;;  %v244_v3 = vadd.f32 %v228_v48, %v184_v43  ;;  %v180_v18 = vmul.f32 %v730_v57, %v693_v30  ;;  %v136_v37 = vadd.f32 %v120_v41, %v76_v59  ;;  %v252_v19 = vadd.f32 %v236_v49, %v192_v47 }
  0xa4   :  { %v245_v63 = vadd.f32 %v229_v21, %v185_v2  ;;  %v246_v28 = vadd.f32 %v230_v51, %v186_v24  ;;  %v253_v38 = vadd.f32 %v237_v22, %v193_v32  ;;  %v254_v39 = vadd.f32 %v238_v35, %v194_v33 }
  0xa5   :  { %v235_v2 = vmul.f32 %v751_v16, %v753_v17  ;;  %v127_v32 = vadd.f32 %v111_v9, %v67_v25  ;;  %v128_v33 = vadd.f32 %v112_v31, %v68_v50  ;;  %v195_v11 = vadd.f32 %v179_v36, %v135_v53 }
  0xa6   :  { %v281_v44 = vadd.f32 %v270_v46, %v245_v63  ;;  %v282_v26 = vadd.f32 %v270_v46, %v246_v28  ;;  %v289_v27 = vadd.f32 %v270_v46, %v253_v38  ;;  %v290_v24 = vadd.f32 %v270_v46, %v254_v39 }
  0xa7   :  { %v251_v14 = vadd.f32 %v235_v2, %v191_v55  ;;  %v187_v25 = vadd.f32 %v171_v52, %v127_v32  ;;  %v188_v50 = vadd.f32 %v172_v23, %v128_v33  ;;  %v196_v29 = vadd.f32 %v180_v18, %v136_v37 }
  0xa8   :  { %297 = vst [vmem:[#allocation2 + $0x20] sm:$0xff] %v281_v44  ;;  %v231_v62 = vmul.f32 %v743_v6, %v797_v40  ;;  %v232_v30 = vmul.f32 %v749_v15, %v797_v40  ;;  %v239_v57 = vmul.f32 %v751_v16, %v797_v40  ;;  %v240_v59 = vmul.f32 %v767_v34, %v797_v40 }
  0xa9   :  { %298 = vst [vmem:[#allocation2 + $0x28] sm:$0xff] %v282_v26 }
  0xaa   :  { %305 = vst [vmem:[#allocation2 + $0x60] sm:$0xff] %v289_v27  ;;  %v265_v58 = vpop.permute.xlu1 %264  ;;  %v247_v20 = vadd.f32 %v231_v62, %v187_v25  ;;  %v248_v52 = vadd.f32 %v232_v30, %v188_v50  ;;  %v255_v21 = vadd.f32 %v239_v57, %v195_v11  ;;  %v256_v22 = vadd.f32 %v240_v59, %v196_v29 }
  0xab   :  { %306 = vst [vmem:[#allocation2 + $0x68] sm:$0xff] %v290_v24  ;;  %v279_v56 = vadd.f32 %v265_v58, %v243_v54  ;;  %v280_v61 = vadd.f32 %v265_v58, %v244_v3  ;;  %v287_v7 = vadd.f32 %v265_v58, %v251_v14  ;;  %v288_v17 = vadd.f32 %v265_v58, %v252_v19 }
  0xad   :  { %295 = vst [vmem:[#allocation2 + $0x10] sm:$0xff] %v279_v56 }
  0xae   :  { %296 = vst [vmem:[#allocation2 + $0x18] sm:$0xff] %v280_v61 }
  0xaf   :  { %303 = vst [vmem:[#allocation2 + $0x50] sm:$0xff] %v287_v7 }
  0xb0   :  { %304 = vst [vmem:[#allocation2 + $0x58] sm:$0xff] %v288_v17 }
  0xb2   :  { %v275_v51 = vpop.permute.xlu1 %274 }
  0xb3   :  { %v283_v35 = vadd.f32 %v275_v51, %v247_v20  ;;  %v284_v23 = vadd.f32 %v275_v51, %v248_v52  ;;  %v291_v9 = vadd.f32 %v275_v51, %v255_v21  ;;  %v292_v6 = vadd.f32 %v275_v51, %v256_v22 }
  0xb5   :  { %299 = vst [vmem:[#allocation2 + $0x30] sm:$0xff] %v283_v35 }
  0xb6   :  { %300 = vst [vmem:[#allocation2 + $0x38] sm:$0xff] %v284_v23 }
  0xb7   :  { %307 = vst [vmem:[#allocation2 + $0x70] sm:$0xff] %v291_v9 }
  0xb8   :  { %308 = vst [vmem:[#allocation2 + $0x78] sm:$0xff] %v292_v6 }
  0xb9   :  { %522 = dma.vmem_to_hbm [thread:$0]  %s515_s13, 2048, %s517_s11, [#allocation3], %s588_s14, %s588_s14, %s589_s15  }
  0xc1   :  { %v330_v15 = vpop.xlane.xlu0 %329 }
  0xc2   :  { %v332_v16 = vmul.f32 0.00390625, %v330_v15 }
  0xc4   :  { %v344_v31 = vperm.slane %v332_v16, 1  ;;  %v394_v43 = vperm.slane %v332_v16, 2  ;;  %v444_v48 = vperm.slane %v332_v16, 3  ;;  %v900_v18 = vperm.slane %v332_v16, 0 }
  0xc6   :  { %v352_v60 = vmul.f32 %v344_v31, %v631_v4  ;;  %v350_v34 = vmul.f32 %v344_v31, %v636_v5  ;;  %v401_v55 = vmul.f32 %v394_v43, %v618_v0  ;;  %v400_v46 = vmul.f32 %v394_v43, %v636_v5 }
  0xc7   :  { %v449_v2 = vmul.f32 %v444_v48, %v623_v1  ;;  %v452_v49 = vmul.f32 %v444_v48, %v631_v4  ;;  %v451_v32 = vmul.f32 %v444_v48, %v618_v0  ;;  %v349_v33 = vmul.f32 %v344_v31, %v623_v1 }
  0xc8   :  { %375 = vrot.lane.b32.xlu0 %v352_v60, %s584_s0  ;;  %371 = vrot.lane.b32.xlu2 %v350_v34, %s584_s0  ;;  %v351_v53 = vmul.f32 %v344_v31, %v618_v0  ;;  %v399_v14 = vmul.f32 %v394_v43, %v623_v1  ;;  %v402_v37 = vmul.f32 %v394_v43, %v631_v4 }
  0xc9   :  { %v340_v58 = vmul.f32 %v900_v18, %v636_v5  ;;  %v450_v7 = vmul.f32 %v444_v48, %v636_v5  ;;  %v341_v60 = vmul.f32 %v900_v18, %v618_v0 }
  0xd1   :  { %v325_v40 = vpop.xlane.xlu2 %324 }
  0xd2   :  { %v857_v63 = vmul.f32 0.00390625, %v325_v40 }
  0xd4   :  { %v343_v28 = vperm.slane %v857_v63, 1  ;;  %v393_v38 = vperm.slane %v857_v63, 2  ;;  %v443_v44 = vperm.slane %v857_v63, 3  ;;  %v333_v62 = vperm.slane %v857_v63, 0 }
  0xd6   :  { %v398_v39 = vmul.f32 %v393_v38, %v631_v4  ;;  %v397_v41 = vmul.f32 %v393_v38, %v618_v0  ;;  %v345_v42 = vmul.f32 %v343_v28, %v623_v1  ;;  %v346_v47 = vmul.f32 %v343_v28, %v636_v5 }
  0xd7   :  { %v446_v26 = vmul.f32 %v443_v44, %v636_v5  ;;  %v445_v27 = vmul.f32 %v443_v44, %v623_v1  ;;  %v347_v45 = vmul.f32 %v343_v28, %v618_v0  ;;  %v448_v24 = vmul.f32 %v443_v44, %v631_v4 }
  0xd8   :  { %417 = vrot.lane.b32.xlu0 %v398_v39, %s585_s2  ;;  %415 = vrot.lane.b32.xlu2 %v397_v41, %s585_s2  ;;  %v348_v36 = vmul.f32 %v343_v28, %v631_v4  ;;  %v395_v54 = vmul.f32 %v393_v38, %v623_v1  ;;  %v396_v3 = vmul.f32 %v393_v38, %v636_v5 }
  0xd9   :  { %361 = vrot.lane.b32.xlu1 %v345_v42, %s584_s0  ;;  %v447_v61 = vmul.f32 %v443_v44, %v618_v0  ;;  %v337_v30 = vmul.f32 %v333_v62, %v618_v0  ;;  %v338_v51 = vmul.f32 %v333_v62, %v631_v4  ;;  %v335_v39 = vmul.f32 %v333_v62, %v623_v1 }
  0xda   :  { %v336_v0 = vmul.f32 %v333_v62, %v636_v5 }
  0xe0   :  { %423 = vrot.lane.b32.xlu0 %v401_v55, %s585_s2  ;;  %421 = vrot.lane.b32.xlu2 %v400_v46, %s585_s2 }
  0xe1   :  { %363 = vrot.lane.b32.xlu1 %v346_v47, %s584_s0 }
  0xe8   :  { %463 = vrot.lane.b32.xlu0 %v446_v26, %s586_s8  ;;  %461 = vrot.lane.b32.xlu2 %v445_v27, %s586_s8 }
  0xe9   :  { %365 = vrot.lane.b32.xlu1 %v347_v45, %s584_s0 }
  0xf0   :  { %469 = vrot.lane.b32.xlu0 %v449_v2, %s586_s8  ;;  %467 = vrot.lane.b32.xlu2 %v448_v24, %s586_s8  ;;  %v339_v24 = vmul.f32 %v900_v18, %v623_v1 }
  0xf1   :  { %367 = vrot.lane.b32.xlu1 %v348_v36, %s584_s0 }
  0xf8   :  { %475 = vrot.lane.b32.xlu0 %v452_v49, %s586_s8  ;;  %473 = vrot.lane.b32.xlu2 %v451_v32, %s586_s8 }
  0xf9   :  { %369 = vrot.lane.b32.xlu1 %v349_v33, %s584_s0 }
 0x101   :  { %373 = vrot.lane.b32.xlu1 %v351_v53, %s584_s0 }
 0x109   :  { %411 = vrot.lane.b32.xlu1 %v395_v54, %s585_s2  ;;  %v342_v54 = vmul.f32 %v900_v18, %v631_v4 }
 0x111   :  { %413 = vrot.lane.b32.xlu1 %v396_v3, %s585_s2 }
 0x119   :  { %419 = vrot.lane.b32.xlu1 %v399_v14, %s585_s2 }
 0x121   :  { %425 = vrot.lane.b32.xlu1 %v402_v37, %s585_s2 }
 0x122   :  { %v372_v19 = vpop.permute.xlu2 %371 }
 0x123   :  { %v390_v56 = vadd.f32 %v372_v19, %v340_v58 }
 0x129   :  { %465 = vrot.lane.b32.xlu1 %v447_v61, %s586_s8 }
 0x131   :  { %471 = vrot.lane.b32.xlu1 %v450_v7, %s586_s8 }
 0x132   :  { %v416_v17 = vpop.permute.xlu2 %415 }
 0x13a   :  { %v422_v25 = vpop.permute.xlu2 %421  ;;  %v376_v20 = vpop.permute.xlu0 %375 }
 0x13b   :  { %v913_v50 = vadd.f32 %v422_v25, %v390_v56  ;;  %v392_v14 = vadd.f32 %v376_v20, %v342_v54 }
 0x142   :  { %v462_v52 = vpop.permute.xlu2 %461 }
 0x14a   :  { %v418_v23 = vpop.permute.xlu0 %417  ;;  %v468_v6 = vpop.permute.xlu2 %467 }
 0x14b   :  { %v362_v11 = vpop.permute.xlu1 %361 }
 0x14c   :  { %v385_v42 = vadd.f32 %v362_v11, %v335_v39 }
 0x152   :  { %v424_v63 = vpop.permute.xlu0 %423  ;;  %v474_v38 = vpop.permute.xlu2 %473 }
 0x153   :  { %v364_v29 = vpop.permute.xlu1 %363 }
 0x154   :  { %v386_v27 = vadd.f32 %v364_v29, %v336_v0 }
 0x15a   :  { %v464_v26 = vpop.permute.xlu0 %463 }
 0x15b   :  { %v366_v57 = vpop.permute.xlu1 %365 }
 0x15c   :  { %v387_v59 = vadd.f32 %v366_v57, %v337_v30 }
 0x15e   :  { %v437_v21 = vadd.f32 %v416_v17, %v387_v59 }
 0x162   :  { %v470_v5 = vpop.permute.xlu0 %469 }
 0x163   :  { %v368_v22 = vpop.permute.xlu1 %367 }
 0x164   :  { %v388_v35 = vadd.f32 %v368_v22, %v338_v51 }
 0x166   :  { %v438_v9 = vadd.f32 %v418_v23, %v388_v35 }
 0x168   :  { %v488_v15 = vadd.f32 %v468_v6, %v438_v9 }
 0x16a   :  { %v496_v16 = vadd.f32 %v488_v15, %v684_v13  ;;  %v476_v58 = vpop.permute.xlu0 %475 }
 0x16b   :  { %v370_v31 = vpop.permute.xlu1 %369 }
 0x16c   :  { %505 = vst.msk [vmem:[%s971_s4 + $0x18] sm:$0xff] %vm501_vm1, %v496_v16  ;;  %v389_v49 = vadd.f32 %v370_v31, %v339_v24 }
 0x173   :  { %v374_v34 = vpop.permute.xlu1 %373 }
 0x174   :  { %v391_v40 = vadd.f32 %v374_v34, %v341_v60 }
 0x176   :  { %v441_v28 = vadd.f32 %v424_v63, %v391_v40 }
 0x178   :  { %v491_v41 = vadd.f32 %v474_v38, %v441_v28 }
 0x17a   :  { %v499_v43 = vadd.f32 %v491_v41, %v666_v10 }
 0x17b   :  { %v412_v55 = vpop.permute.xlu1 %411 }
 0x17c   :  { %508 = vst.msk [vmem:[%s971_s4 + $0x30] sm:$0xff] %vm501_vm1, %v499_v43  ;;  %v435_v46 = vadd.f32 %v412_v55, %v385_v42 }
 0x17e   :  { %v485_v47 = vadd.f32 %v462_v52, %v435_v46 }
 0x180   :  { %v493_v44 = vadd.f32 %v485_v47, %v656_v8 }
 0x182   :  { %502 = vst.msk [vmem:[%s971_s4] sm:$0xff] %vm501_vm1, %v493_v44 }
 0x183   :  { %v414_v45 = vpop.permute.xlu1 %413 }
 0x184   :  { %v436_v48 = vadd.f32 %v414_v45, %v386_v27 }
 0x186   :  { %v486_v2 = vadd.f32 %v464_v26, %v436_v48 }
 0x188   :  { %v494_v36 = vadd.f32 %v486_v2, %v676_v12 }
 0x18a   :  { %503 = vst.msk [vmem:[%s971_s4 + $0x8] sm:$0xff] %vm501_vm1, %v494_v36 }
 0x18b   :  { %v420_v32 = vpop.permute.xlu1 %419 }
 0x18c   :  { %v439_v33 = vadd.f32 %v420_v32, %v389_v49 }
 0x18e   :  { %v489_v53 = vadd.f32 %v470_v5, %v439_v33 }
 0x190   :  { %v497_v3 = vadd.f32 %v489_v53, %v656_v8 }
 0x192   :  { %506 = vst.msk [vmem:[%s971_s4 + $0x20] sm:$0xff] %vm501_vm1, %v497_v3 }
 0x193   :  { %v426_v1 = vpop.permute.xlu1 %425 }
 0x194   :  { %v442_v37 = vadd.f32 %v426_v1, %v392_v14 }
 0x196   :  { %v492_v19 = vadd.f32 %v476_v58, %v442_v37 }
 0x198   :  { %v500_v56 = vadd.f32 %v492_v19, %v684_v13 }
 0x19a   :  { %509 = vst.msk [vmem:[%s971_s4 + $0x38] sm:$0xff] %vm501_vm1, %v500_v56 }
 0x19b   :  { %v466_v4 = vpop.permute.xlu1 %465 }
 0x19c   :  { %v487_v18 = vadd.f32 %v466_v4, %v437_v21 }
 0x19e   :  { %v495_v8 = vadd.f32 %v487_v18, %v666_v10 }
 0x1a0   :  { %504 = vst.msk [vmem:[%s971_s4 + $0x10] sm:$0xff] %vm501_vm1, %v495_v8 }
 0x1a3   :  { %v472_v61 = vpop.permute.xlu1 %471 }
 0x1a4   :  { %v490_v7 = vadd.f32 %v472_v61, %v913_v50 }
 0x1a6   :  { %v498_v17 = vadd.f32 %v490_v7, %v676_v12 }
 0x1a8   :  { %507 = vst.msk [vmem:[%s971_s4 + $0x28] sm:$0xff] %vm501_vm1, %v498_v17 }
 0x1a9   :  { %578 = dma.done.wait [#allocation3], 2048  }
 0x1aa   :  { %579 = vsyncadd [#allocation3], 4294965248 }
 0x1ab   :  { %531 = vsyncpa [#allocation3], 1 }

</bundles_post_ra>
